<compile_context>
chip_gen: v7x
topology: tpu7x:2x2x1
jax: 0.10.0
libtpu: 0.0.40
codegen_flags: <defaults>
</compile_context>

<pallas_src>
import jax
import jax.numpy as jnp
import numpy as np
from jax import lax
from jax.experimental import pallas as pl
from jax.experimental.pallas import tpu as pltpu


# -----------------------------------------------------------------------------
# Kernel
# -----------------------------------------------------------------------------
def rna_ffwd_kernel(
    x_ref,     # (TB, TS, D)  bf16  streamed activations
    msk_ref,   # (TB, TS, 1)  f32   attention-mask tile
    w1t_ref,   # (D, D)       f32   linear_1.weight.T (resident)
    w2t_ref,   # (D, D)       f32   linear_2.weight.T (resident)
    wft_ref,   # (D, Hp)      f32   final.weight.T, lane-padded (resident)
    vec_ref,   # (8, D)       f32   rows: [g1, be1, b1, g2, be2, b2, 0, 0]
    bf_ref,    # (1, Hp)      f32   final bias, lane-padded (resident)
    o_ref,     # (TB, Hp)     f32   output block (written at last S step)
    acc_ref,   # (TB, D)      f32   pooled-sum accumulator (scratch)
    len_ref,   # (TB, 1)      f32   sentence-length accumulator (scratch)
):
    s = pl.program_id(1)

    @pl.when(s == 0)
    def _init():
        acc_ref[...] = jnp.zeros_like(acc_ref)
        len_ref[...] = jnp.zeros_like(len_ref)

    # Masked pooling accumulation over the current S tile.  (The module sums x
    # over ALL positions and uses the mask only for the 1/sqrt(len) scale; the
    # S padding added by the wrapper is zero, so it contributes nothing.)
    acc_ref[...] += jnp.sum(x_ref[...].astype(jnp.float32), axis=1)
    len_ref[...] += jnp.sum(msk_ref[...], axis=1)

    @pl.when(s == pl.num_programs(1) - 1)
    def _finalize():
        g1, be1, b1 = vec_ref[0:1, :], vec_ref[1:2, :], vec_ref[2:3, :]
        g2, be2, b2 = vec_ref[3:4, :], vec_ref[4:5, :], vec_ref[5:6, :]

        def layernorm(v, gamma, beta):
            mu = jnp.mean(v, axis=-1, keepdims=True)
            var = jnp.mean((v - mu) * (v - mu), axis=-1, keepdims=True)
            return (v - mu) * lax.rsqrt(var + 1e-5) * gamma + beta

        def gelu_exact(v):  # F.gelu default (erf-based)
            return 0.5 * v * (1.0 + lax.erf(v * 0.7071067811865476))

        # x = (1/sqrt(sentence_lengths)) * x.sum(dim=1)
        xs = acc_ref[...] * lax.rsqrt(len_ref[...])            # (TB, D) f32

        # x = x + gelu(linear_1(norm1(x)))
        h1 = jnp.dot(layernorm(xs, g1, be1), w1t_ref[...],
                     preferred_element_type=jnp.float32) + b1
        xs = xs + gelu_exact(h1)

        # x = x + gelu(linear_2(norm2(x)))
        h2 = jnp.dot(layernorm(xs, g2, be2), w2t_ref[...],
                     preferred_element_type=jnp.float32) + b2
        xs = xs + gelu_exact(h2)

        # F.normalize(final(x), dim=1, p=2); padded output lanes are zero and
        # do not change the norm.
        y = (jnp.dot(xs, wft_ref[...], preferred_element_type=jnp.float32)
             + bf_ref[...])
        ssq = jnp.maximum(jnp.sum(y * y, axis=1, keepdims=True), 1e-24)
        o_ref[...] = y * lax.rsqrt(ssq)


# -----------------------------------------------------------------------------
# Tiling / packing helpers
# -----------------------------------------------------------------------------
def _round_up(v, m):
    return ((v + m - 1) // m) * m


def _choose_tiles(B, S, D, x_itemsize, per_buffer_budget=8 * 1024 * 1024):
    """TB = batch (MXU-M) tile, TS = streamed sequence tile.

    Single x buffer kept <= ~8 MiB so double-buffering fits comfortably inside
    v7x's 64 MiB VMEM (and trivially on v5e/v6e).
    """
    TB = min(_round_up(B, 8), 128)
    max_ts = max(8, (per_buffer_budget // (TB * D * x_itemsize)) // 8 * 8)
    TS = min(_round_up(S, 8), max_ts)
    return TB, TS


def _pack_params(params, D, H, Hp):
    f32 = jnp.float32
    w1_t = jnp.asarray(params["w1"], f32).T                               # (D, D)
    w2_t = jnp.asarray(params["w2"], f32).T                               # (D, D)
    wf_t = jnp.zeros((D, Hp), f32).at[:, :H].set(jnp.asarray(params["wf"], f32).T)
    bf_p = jnp.zeros((1, Hp), f32).at[0, :H].set(jnp.asarray(params["bf"], f32))
    vecs = jnp.zeros((8, D), f32)
    for i, name in enumerate(("g1", "be1", "b1", "g2", "be2", "b2")):
        vecs = vecs.at[i, :].set(jnp.asarray(params[name], f32))
    return w1_t, w2_t, wf_t, vecs, bf_p


# -----------------------------------------------------------------------------
# Wrapper
# -----------------------------------------------------------------------------
def rna_ffwd_forward(x, attn_msk, params, *, x_dtype=jnp.bfloat16):
    B, S, D = x.shape
    H = params["wf"].shape[0]
    Hp = _round_up(H, 128)                     # lane-dense output, sliced below

    x_itemsize = np.dtype(x_dtype).itemsize
    TB, TS = _choose_tiles(B, S, D, x_itemsize)
    B_pad, S_pad = _round_up(B, TB), _round_up(S, TS)

    # Zero-pad: padded S positions contribute nothing to the pooled sum or the
    # lengths; padded batch rows are discarded by the final slice.
    x_p = jnp.zeros((B_pad, S_pad, D), x_dtype).at[:B, :S, :].set(x.astype(x_dtype))
    m_p = jnp.zeros((B_pad, S_pad, 1), jnp.float32).at[:B, :S, 0].set(
        attn_msk.astype(jnp.float32))

    w1_t, w2_t, wf_t, vecs, bf_p = _pack_params(params, D, H, Hp)

    grid = (B_pad // TB, S_pad // TS)
    const = lambda b, s: (0, 0)

    # VMEM budget: double-buffered x/mask stream + resident params + output +
    # scratch, with headroom; capped well below v7x's 64 MiB physical VMEM.
    x_tile = TB * TS * D * x_itemsize
    m_tile = TB * TS * 4
    resident = (2 * D * D + D * Hp + 8 * D + Hp) * 4
    other = 2 * TB * Hp * 4 + TB * (D + 1) * 4
    vmem_limit = int(min(
        48 << 20,
        max(2 * (x_tile + m_tile) + resident + other + (2 << 20), 16 << 20)))

    out = pl.pallas_call(
        rna_ffwd_kernel,
        out_shape=jax.ShapeDtypeStruct((B_pad, Hp), jnp.float32),
        grid_spec=pltpu.PrefetchScalarGridSpec(
            num_scalar_prefetch=0,
            grid=grid,
            in_specs=[
                pl.BlockSpec((TB, TS, D), lambda b, s: (b, s, 0)),  # x (streamed)
                pl.BlockSpec((TB, TS, 1), lambda b, s: (b, s, 0)),  # mask (streamed)
                pl.BlockSpec((D, D), const),                        # w1^T (resident)
                pl.BlockSpec((D, D), const),                        # w2^T (resident)
                pl.BlockSpec((D, Hp), const),                       # wf^T (resident)
                pl.BlockSpec((8, D), const),                        # packed LN/bias vecs
                pl.BlockSpec((1, Hp), const),                       # final bias
            ],
            out_specs=pl.BlockSpec((TB, Hp), lambda b, s: (b, 0)),
            scratch_shapes=[
                pltpu.VMEM((TB, D), jnp.float32),   # pooled-sum accumulator
                pltpu.VMEM((TB, 1), jnp.float32),   # sentence-length accumulator
            ],
        ),
        compiler_params=pltpu.CompilerParams(
            dimension_semantics=("parallel", "arbitrary"),
            vmem_limit_bytes=vmem_limit,
        ),
    )(x_p, m_p, w1_t, w2_t, wf_t, vecs, bf_p)

    return out[:B, :H]


# -----------------------------------------------------------------------------
# Deterministic parameter init (mirrors the module's __init__):
#   linear_1, linear_2: (D, D) orthogonal weights, uniform biases
#   norm1, norm2: LayerNorm(D) gamma=1, beta=0
#   final: Linear(D -> H), uniform weights/biases
# -----------------------------------------------------------------------------
def init_params(key, D, H):
    ks = jax.random.split(key, 6)

    def orthogonal(k, n):
        a = jax.random.normal(k, (n, n), dtype=jnp.float32)
        q, r = jnp.linalg.qr(a)
        return q * jnp.sign(jnp.diag(r))[None, :]

    bound = 1.0 / np.sqrt(D)
    return {
        "w1": orthogonal(ks[0], D),                                            # (D, D)
        "b1": jax.random.uniform(ks[2], (D,), minval=-bound, maxval=bound),
        "w2": orthogonal(ks[1], D),                                            # (D, D)
        "b2": jax.random.uniform(ks[3], (D,), minval=-bound, maxval=bound),
        "g1": jnp.ones((D,), jnp.float32),
        "be1": jnp.zeros((D,), jnp.float32),
        "g2": jnp.ones((D,), jnp.float32),
        "be2": jnp.zeros((D,), jnp.float32),
        "wf": jax.random.uniform(ks[4], (H, D), minval=-bound, maxval=bound),  # (H, D)
        "bf": jax.random.uniform(ks[5], (H,), minval=-bound, maxval=bound),
    }


# Pure-JAX reference for correctness checking (same bf16 x streaming dtype so
# the comparison is apples-to-apples; all arithmetic in f32).
def rna_ffwd_reference(x, attn_msk, p, x_dtype=jnp.bfloat16):
    x = x.astype(x_dtype).astype(jnp.float32)
    lengths = jnp.sum(attn_msk, axis=1, keepdims=True)
    xs = jnp.sum(x, axis=1) / jnp.sqrt(lengths)

    def ln(v, g, b):
        mu = jnp.mean(v, axis=-1, keepdims=True)
        var = jnp.mean((v - mu) ** 2, axis=-1, keepdims=True)
        return (v - mu) / jnp.sqrt(var + 1e-5) * g + b

    def gelu(v):
        return 0.5 * v * (1.0 + lax.erf(v * 0.7071067811865476))

    xs = xs + gelu(ln(xs, p["g1"], p["be1"]) @ p["w1"].T + p["b1"])
    xs = xs + gelu(ln(xs, p["g2"], p["be2"]) @ p["w2"].T + p["b2"])
    y = xs @ p["wf"].T + p["bf"]
    nrm = jnp.sqrt(jnp.sum(y * y, axis=1, keepdims=True))
    return y / jnp.maximum(nrm, 1e-12)


if __name__ == "__main__":
    # model_config: num_embed_hidden=32, num_attention_heads=4 -> D=128
    B, S, H, NHEADS = 2, 8, 32, 4
    D = H * NHEADS

    key = jax.random.PRNGKey(0)
    kx, kp = jax.random.split(key)

    x = jax.random.normal(kx, (B, S, D), dtype=jnp.float32)
    # attention mask with varying valid lengths (1 = valid token)
    attn_msk = jnp.stack(
        [
            jnp.where(jnp.arange(S) < 6, 1.0, 0.0),
            jnp.where(jnp.arange(S) < 3, 1.0, 0.0),
        ]
    ).astype(jnp.float32)

    params = init_params(kp, D, H)

    fwd = jax.jit(rna_ffwd_forward)
    out = jax.block_until_ready(fwd(x, attn_msk, params))

    ref = rna_ffwd_reference(x, attn_msk, params)
    assert out.shape == (B, H)
    np.testing.assert_allclose(np.asarray(out), np.asarray(ref), rtol=1e-4, atol=1e-4)

    print("KERNEL_OK")
</pallas_src>

<mosaic_0001>
module attributes {stable_mosaic.version = 11 : i64} {
  func.func @rna_ffwd_kernel(%arg0: i32, %arg1: i32, %arg2: memref<8x8x128xbf16, #tpu.memory_space<vmem>>, %arg3: memref<8x8x1xf32, #tpu.memory_space<vmem>>, %arg4: memref<128x128xf32, #tpu.memory_space<vmem>>, %arg5: memref<128x128xf32, #tpu.memory_space<vmem>>, %arg6: memref<128x128xf32, #tpu.memory_space<vmem>>, %arg7: memref<8x128xf32, #tpu.memory_space<vmem>>, %arg8: memref<1x128xf32, #tpu.memory_space<vmem>>, %arg9: memref<8x128xf32, #tpu.memory_space<vmem>>, %arg10: memref<8x128xf32, #tpu.memory_space<vmem>>, %arg11: memref<8x1xf32, #tpu.memory_space<vmem>>) attributes {dimension_semantics = [#tpu.dimension_semantics<parallel>, #tpu.dimension_semantics<arbitrary>], iteration_bounds = array<i64: 1, 1>, scalar_prefetch = 0 : i64, scratch_operands = 2 : i64, tpu.core_type = #tpu.core_type<tc>, window_params = [{transform_indices = @transform_0, window_bounds = array<i64: 8, 8, 128>}, {transform_indices = @transform_1, window_bounds = array<i64: 8, 8, 1>}, {pipeline_mode = #tpu.pipeline_mode<synchronous>, transform_indices = @transform_2, window_bounds = array<i64: 128, 128>}, {pipeline_mode = #tpu.pipeline_mode<synchronous>, transform_indices = @transform_3, window_bounds = array<i64: 128, 128>}, {pipeline_mode = #tpu.pipeline_mode<synchronous>, transform_indices = @transform_4, window_bounds = array<i64: 128, 128>}, {pipeline_mode = #tpu.pipeline_mode<synchronous>, transform_indices = @transform_5, window_bounds = array<i64: 8, 128>}, {pipeline_mode = #tpu.pipeline_mode<synchronous>, transform_indices = @transform_6, window_bounds = array<i64: 1, 128>}, {transform_indices = @transform_7, window_bounds = array<i64: 8, 128>}]} {
    %c0_i32 = arith.constant 0 : i32
    %0 = arith.cmpi eq, %arg1, %c0_i32 : i32
    %1 = arith.extui %0 : i1 to i32
    %c0_i32_0 = arith.constant 0 : i32
    %2 = arith.cmpi ne, %1, %c0_i32_0 : i32
    scf.if %2 {
      %cst_17 = arith.constant 0.000000e+00 : f32
      %17 = vector.broadcast %cst_17 : f32 to vector<8x128xf32>
      %c0_18 = arith.constant 0 : index
      %c0_19 = arith.constant 0 : index
      %18 = vector.load %arg10[%c0_18, %c0_19] : memref<8x128xf32, #tpu.memory_space<vmem>>, vector<8x128xf32>
      tpu.vector_store %arg10[%c0_18, %c0_19], %17 {strides = array<i32>} : memref<8x128xf32, #tpu.memory_space<vmem>>, vector<8x128xf32>,
      %cst_20 = arith.constant 0.000000e+00 : f32
      %19 = vector.broadcast %cst_20 : f32 to vector<8x1xf32>
      %c0_21 = arith.constant 0 : index
      %c0_22 = arith.constant 0 : index
      %20 = vector.load %arg11[%c0_21, %c0_22] : memref<8x1xf32, #tpu.memory_space<vmem>>, vector<8x1xf32>
      tpu.vector_store %arg11[%c0_21, %c0_22], %19 {strides = array<i32>} : memref<8x1xf32, #tpu.memory_space<vmem>>, vector<8x1xf32>,
    } else {
    }
    %c0 = arith.constant 0 : index
    %c0_1 = arith.constant 0 : index
    %3 = vector.load %arg10[%c0, %c0_1] : memref<8x128xf32, #tpu.memory_space<vmem>>, vector<8x128xf32>
    %c0_2 = arith.constant 0 : index
    %c0_3 = arith.constant 0 : index
    %c0_4 = arith.constant 0 : index
    %4 = vector.load %arg2[%c0_2, %c0_3, %c0_4] : memref<8x8x128xbf16, #tpu.memory_space<vmem>>, vector<8x8x128xbf16>
    %5 = arith.extf %4 : vector<8x8x128xbf16> to vector<8x8x128xf32>
    %cst = arith.constant dense<0.000000e+00> : vector<8x128xf32>
    %6 = vector.multi_reduction <add>, %5, %cst [1] : vector<8x8x128xf32> to vector<8x128xf32>
    %7 = arith.addf %3, %6 : vector<8x128xf32>
    %c0_5 = arith.constant 0 : index
    %c0_6 = arith.constant 0 : index
    %8 = vector.load %arg10[%c0_5, %c0_6] : memref<8x128xf32, #tpu.memory_space<vmem>>, vector<8x128xf32>
    tpu.vector_store %arg10[%c0_5, %c0_6], %7 {strides = array<i32>} : memref<8x128xf32, #tpu.memory_space<vmem>>, vector<8x128xf32>,
    %c0_7 = arith.constant 0 : index
    %c0_8 = arith.constant 0 : index
    %9 = vector.load %arg11[%c0_7, %c0_8] : memref<8x1xf32, #tpu.memory_space<vmem>>, vector<8x1xf32>
    %c0_9 = arith.constant 0 : index
    %c0_10 = arith.constant 0 : index
    %c0_11 = arith.constant 0 : index
    %10 = vector.load %arg3[%c0_9, %c0_10, %c0_11] : memref<8x8x1xf32, #tpu.memory_space<vmem>>, vector<8x8x1xf32>
    %cst_12 = arith.constant dense<0.000000e+00> : vector<8x1xf32>
    %11 = vector.multi_reduction <add>, %10, %cst_12 [1] : vector<8x8x1xf32> to vector<8x1xf32>
    %12 = arith.addf %9, %11 : vector<8x1xf32>
    %c0_13 = arith.constant 0 : index
    %c0_14 = arith.constant 0 : index
    %13 = vector.load %arg11[%c0_13, %c0_14] : memref<8x1xf32, #tpu.memory_space<vmem>>, vector<8x1xf32>
    tpu.vector_store %arg11[%c0_13, %c0_14], %12 {strides = array<i32>} : memref<8x1xf32, #tpu.memory_space<vmem>>, vector<8x1xf32>,
    %c0_i32_15 = arith.constant 0 : i32
    %14 = arith.cmpi eq, %arg1, %c0_i32_15 : i32
    %15 = arith.extui %14 : i1 to i32
    %c0_i32_16 = arith.constant 0 : i32
    %16 = arith.cmpi ne, %15, %c0_i32_16 : i32
    scf.if %16 {
      %c0_17 = arith.constant 0 : index
      %c0_18 = arith.constant 0 : index
      %17 = vector.load %arg7[%c0_17, %c0_18] : memref<8x128xf32, #tpu.memory_space<vmem>>, vector<1x128xf32>
      %c1 = arith.constant 1 : index
      %c0_19 = arith.constant 0 : index
      %18 = vector.load %arg7[%c1, %c0_19] : memref<8x128xf32, #tpu.memory_space<vmem>>, vector<1x128xf32>
      %c2 = arith.constant 2 : index
      %c0_20 = arith.constant 0 : index
      %19 = vector.load %arg7[%c2, %c0_20] : memref<8x128xf32, #tpu.memory_space<vmem>>, vector<1x128xf32>
      %c3 = arith.constant 3 : index
      %c0_21 = arith.constant 0 : index
      %20 = vector.load %arg7[%c3, %c0_21] : memref<8x128xf32, #tpu.memory_space<vmem>>, vector<1x128xf32>
      %c4 = arith.constant 4 : index
      %c0_22 = arith.constant 0 : index
      %21 = vector.load %arg7[%c4, %c0_22] : memref<8x128xf32, #tpu.memory_space<vmem>>, vector<1x128xf32>
      %c5 = arith.constant 5 : index
      %c0_23 = arith.constant 0 : index
      %22 = vector.load %arg7[%c5, %c0_23] : memref<8x128xf32, #tpu.memory_space<vmem>>, vector<1x128xf32>
      %c0_24 = arith.constant 0 : index
      %c0_25 = arith.constant 0 : index
      %23 = vector.load %arg10[%c0_24, %c0_25] : memref<8x128xf32, #tpu.memory_space<vmem>>, vector<8x128xf32>
      %c0_26 = arith.constant 0 : index
      %c0_27 = arith.constant 0 : index
      %24 = vector.load %arg11[%c0_26, %c0_27] : memref<8x1xf32, #tpu.memory_space<vmem>>, vector<8x1xf32>
      %25 = math.rsqrt %24 : vector<8x1xf32>
      %26 = vector.broadcast %25 : vector<8x1xf32> to vector<8x128xf32>
      %27 = arith.mulf %23, %26 : vector<8x128xf32>
      %cst_28 = arith.constant dense<0.000000e+00> : vector<8xf32>
      %28 = vector.multi_reduction <add>, %27, %cst_28 [1] : vector<8x128xf32> to vector<8xf32>
      %29 = vector.shape_cast %28 : vector<8xf32> to vector<8x1xf32>
      %cst_29 = arith.constant 1.280000e+02 : f32
      %30 = vector.broadcast %cst_29 : f32 to vector<8x1xf32>
      %31 = arith.divf %29, %30 : vector<8x1xf32>
      %32 = vector.broadcast %31 : vector<8x1xf32> to vector<8x128xf32>
      %33 = arith.subf %27, %32 : vector<8x128xf32>
      %34 = vector.broadcast %31 : vector<8x1xf32> to vector<8x128xf32>
      %35 = arith.subf %27, %34 : vector<8x128xf32>
      %36 = arith.mulf %33, %35 : vector<8x128xf32>
      %cst_30 = arith.constant dense<0.000000e+00> : vector<8xf32>
      %37 = vector.multi_reduction <add>, %36, %cst_30 [1] : vector<8x128xf32> to vector<8xf32>
      %38 = vector.shape_cast %37 : vector<8xf32> to vector<8x1xf32>
      %cst_31 = arith.constant 1.280000e+02 : f32
      %39 = vector.broadcast %cst_31 : f32 to vector<8x1xf32>
      %40 = arith.divf %38, %39 : vector<8x1xf32>
      %41 = vector.broadcast %31 : vector<8x1xf32> to vector<8x128xf32>
      %42 = arith.subf %27, %41 : vector<8x128xf32>
      %cst_32 = arith.constant 9.99999974E-6 : f32
      %43 = vector.broadcast %cst_32 : f32 to vector<8x1xf32>
      %44 = arith.addf %40, %43 : vector<8x1xf32>
      %45 = math.rsqrt %44 : vector<8x1xf32>
      %46 = vector.broadcast %45 : vector<8x1xf32> to vector<8x128xf32>
      %47 = arith.mulf %42, %46 : vector<8x128xf32>
      %48 = vector.broadcast %17 : vector<1x128xf32> to vector<8x128xf32>
      %49 = arith.mulf %47, %48 : vector<8x128xf32>
      %50 = vector.broadcast %18 : vector<1x128xf32> to vector<8x128xf32>
      %51 = arith.addf %49, %50 : vector<8x128xf32>
      %c0_33 = arith.constant 0 : index
      %c0_34 = arith.constant 0 : index
      %52 = vector.load %arg4[%c0_33, %c0_34] : memref<128x128xf32, #tpu.memory_space<vmem>>, vector<128x128xf32>
      %cst_35 = arith.constant dense<0.000000e+00> : vector<8x128xf32>
      %53 = tpu.matmul %51, %52, %cst_35 {dimension_numbers = #tpu.dot_dimension_numbers<[1], [0], [0], [1], [0, 0, 1, 1], [], []>} : vector<8x128xf32>, vector<128x128xf32>, vector<8x128xf32> -> vector<8x128xf32>
      %54 = vector.broadcast %19 : vector<1x128xf32> to vector<8x128xf32>
      %55 = arith.addf %53, %54 : vector<8x128xf32>
      %cst_36 = arith.constant 5.000000e-01 : f32
      %56 = vector.broadcast %cst_36 : f32 to vector<8x128xf32>
      %57 = arith.mulf %56, %55 : vector<8x128xf32>
      %cst_37 = arith.constant 0.707106769 : f32
      %58 = vector.broadcast %cst_37 : f32 to vector<8x128xf32>
      %59 = arith.mulf %55, %58 : vector<8x128xf32>
      %60 = math.erf %59 : vector<8x128xf32>
      %cst_38 = arith.constant 1.000000e+00 : f32
      %61 = vector.broadcast %cst_38 : f32 to vector<8x128xf32>
      %62 = arith.addf %61, %60 : vector<8x128xf32>
      %63 = arith.mulf %57, %62 : vector<8x128xf32>
      %64 = arith.addf %27, %63 : vector<8x128xf32>
      %cst_39 = arith.constant dense<0.000000e+00> : vector<8xf32>
      %65 = vector.multi_reduction <add>, %64, %cst_39 [1] : vector<8x128xf32> to vector<8xf32>
      %66 = vector.shape_cast %65 : vector<8xf32> to vector<8x1xf32>
      %cst_40 = arith.constant 1.280000e+02 : f32
      %67 = vector.broadcast %cst_40 : f32 to vector<8x1xf32>
      %68 = arith.divf %66, %67 : vector<8x1xf32>
      %69 = vector.broadcast %68 : vector<8x1xf32> to vector<8x128xf32>
      %70 = arith.subf %64, %69 : vector<8x128xf32>
      %71 = vector.broadcast %68 : vector<8x1xf32> to vector<8x128xf32>
      %72 = arith.subf %64, %71 : vector<8x128xf32>
      %73 = arith.mulf %70, %72 : vector<8x128xf32>
      %cst_41 = arith.constant dense<0.000000e+00> : vector<8xf32>
      %74 = vector.multi_reduction <add>, %73, %cst_41 [1] : vector<8x128xf32> to vector<8xf32>
      %75 = vector.shape_cast %74 : vector<8xf32> to vector<8x1xf32>
      %cst_42 = arith.constant 1.280000e+02 : f32
      %76 = vector.broadcast %cst_42 : f32 to vector<8x1xf32>
      %77 = arith.divf %75, %76 : vector<8x1xf32>
      %78 = vector.broadcast %68 : vector<8x1xf32> to vector<8x128xf32>
      %79 = arith.subf %64, %78 : vector<8x128xf32>
      %cst_43 = arith.constant 9.99999974E-6 : f32
      %80 = vector.broadcast %cst_43 : f32 to vector<8x1xf32>
      %81 = arith.addf %77, %80 : vector<8x1xf32>
      %82 = math.rsqrt %81 : vector<8x1xf32>
      %83 = vector.broadcast %82 : vector<8x1xf32> to vector<8x128xf32>
      %84 = arith.mulf %79, %83 : vector<8x128xf32>
      %85 = vector.broadcast %20 : vector<1x128xf32> to vector<8x128xf32>
      %86 = arith.mulf %84, %85 : vector<8x128xf32>
      %87 = vector.broadcast %21 : vector<1x128xf32> to vector<8x128xf32>
      %88 = arith.addf %86, %87 : vector<8x128xf32>
      %c0_44 = arith.constant 0 : index
      %c0_45 = arith.constant 0 : index
      %89 = vector.load %arg5[%c0_44, %c0_45] : memref<128x128xf32, #tpu.memory_space<vmem>>, vector<128x128xf32>
      %cst_46 = arith.constant dense<0.000000e+00> : vector<8x128xf32>
      %90 = tpu.matmul %88, %89, %cst_46 {dimension_numbers = #tpu.dot_dimension_numbers<[1], [0], [0], [1], [0, 0, 1, 1], [], []>} : vector<8x128xf32>, vector<128x128xf32>, vector<8x128xf32> -> vector<8x128xf32>
      %91 = vector.broadcast %22 : vector<1x128xf32> to vector<8x128xf32>
      %92 = arith.addf %90, %91 : vector<8x128xf32>
      %cst_47 = arith.constant 5.000000e-01 : f32
      %93 = vector.broadcast %cst_47 : f32 to vector<8x128xf32>
      %94 = arith.mulf %93, %92 : vector<8x128xf32>
      %cst_48 = arith.constant 0.707106769 : f32
      %95 = vector.broadcast %cst_48 : f32 to vector<8x128xf32>
      %96 = arith.mulf %92, %95 : vector<8x128xf32>
      %97 = math.erf %96 : vector<8x128xf32>
      %cst_49 = arith.constant 1.000000e+00 : f32
      %98 = vector.broadcast %cst_49 : f32 to vector<8x128xf32>
      %99 = arith.addf %98, %97 : vector<8x128xf32>
      %100 = arith.mulf %94, %99 : vector<8x128xf32>
      %101 = arith.addf %64, %100 : vector<8x128xf32>
      %c0_50 = arith.constant 0 : index
      %c0_51 = arith.constant 0 : index
      %102 = vector.load %arg6[%c0_50, %c0_51] : memref<128x128xf32, #tpu.memory_space<vmem>>, vector<128x128xf32>
      %cst_52 = arith.constant dense<0.000000e+00> : vector<8x128xf32>
      %103 = tpu.matmul %101, %102, %cst_52 {dimension_numbers = #tpu.dot_dimension_numbers<[1], [0], [0], [1], [0, 0, 1, 1], [], []>} : vector<8x128xf32>, vector<128x128xf32>, vector<8x128xf32> -> vector<8x128xf32>
      %c0_53 = arith.constant 0 : index
      %c0_54 = arith.constant 0 : index
      %104 = vector.load %arg8[%c0_53, %c0_54] : memref<1x128xf32, #tpu.memory_space<vmem>>, vector<1x128xf32>
      %105 = vector.broadcast %104 : vector<1x128xf32> to vector<8x128xf32>
      %106 = arith.addf %103, %105 : vector<8x128xf32>
      %107 = arith.mulf %106, %106 : vector<8x128xf32>
      %cst_55 = arith.constant dense<0.000000e+00> : vector<8xf32>
      %108 = vector.multi_reduction <add>, %107, %cst_55 [1] : vector<8x128xf32> to vector<8xf32>
      %109 = vector.shape_cast %108 : vector<8xf32> to vector<8x1xf32>
      %cst_56 = arith.constant 1.000000e-24 : f32
      %110 = vector.broadcast %cst_56 : f32 to vector<8x1xf32>
      %111 = arith.maximumf %109, %110 : vector<8x1xf32>
      %112 = math.rsqrt %111 : vector<8x1xf32>
      %113 = vector.broadcast %112 : vector<8x1xf32> to vector<8x128xf32>
      %114 = arith.mulf %106, %113 : vector<8x128xf32>
      %c0_57 = arith.constant 0 : index
      %c0_58 = arith.constant 0 : index
      %115 = vector.load %arg9[%c0_57, %c0_58] : memref<8x128xf32, #tpu.memory_space<vmem>>, vector<8x128xf32>
      tpu.vector_store %arg9[%c0_57, %c0_58], %114 {strides = array<i32>} : memref<8x128xf32, #tpu.memory_space<vmem>>, vector<8x128xf32>,
    } else {
    }
    return
  }
  func.func @transform_0(%arg0: i32, %arg1: i32) -> (i32, i32, i32) {
    %c0_i32 = arith.constant 0 : i32
    %c0_i32_0 = arith.constant 0 : i32
    return %arg0, %arg1, %c0_i32 : i32, i32, i32
  }
  func.func @transform_1(%arg0: i32, %arg1: i32) -> (i32, i32, i32) {
    %c0_i32 = arith.constant 0 : i32
    %c0_i32_0 = arith.constant 0 : i32
    return %arg0, %arg1, %c0_i32 : i32, i32, i32
  }
  func.func @transform_2(%arg0: i32, %arg1: i32) -> (i32, i32) {
    %c0_i32 = arith.constant 0 : i32
    %c0_i32_0 = arith.constant 0 : i32
    %c0_i32_1 = arith.constant 0 : i32
    return %c0_i32, %c0_i32_0 : i32, i32
  }
  func.func @transform_3(%arg0: i32, %arg1: i32) -> (i32, i32) {
    %c0_i32 = arith.constant 0 : i32
    %c0_i32_0 = arith.constant 0 : i32
    %c0_i32_1 = arith.constant 0 : i32
    return %c0_i32, %c0_i32_0 : i32, i32
  }
  func.func @transform_4(%arg0: i32, %arg1: i32) -> (i32, i32) {
    %c0_i32 = arith.constant 0 : i32
    %c0_i32_0 = arith.constant 0 : i32
    %c0_i32_1 = arith.constant 0 : i32
    return %c0_i32, %c0_i32_0 : i32, i32
  }
  func.func @transform_5(%arg0: i32, %arg1: i32) -> (i32, i32) {
    %c0_i32 = arith.constant 0 : i32
    %c0_i32_0 = arith.constant 0 : i32
    %c0_i32_1 = arith.constant 0 : i32
    return %c0_i32, %c0_i32_0 : i32, i32
  }
  func.func @transform_6(%arg0: i32, %arg1: i32) -> (i32, i32) {
    %c0_i32 = arith.constant 0 : i32
    %c0_i32_0 = arith.constant 0 : i32
    %c0_i32_1 = arith.constant 0 : i32
    return %c0_i32, %c0_i32_0 : i32, i32
  }
  func.func @transform_7(%arg0: i32, %arg1: i32) -> (i32, i32) {
    %c0_i32 = arith.constant 0 : i32
    %c0_i32_0 = arith.constant 0 : i32
    return %arg0, %c0_i32 : i32, i32
  }
}

</mosaic_0001>

<bundles_post_ra>
// kernel: rna_ffwd_forward.1
= control target key start
LH: loop header
LB: loop body
LE: loop exit
PB: predicated region body
PF: predicated region fallthrough
CT: control target
= control target key end

     0   :  { %vm31_vm0 = vcmask 7168   ;;  %v835_v0 = vmov 0   ;;  %v836_v1 = vmov 0.0   ;;  %vm106_vm1 = vcmask 1041409   ;;  %s1148_s1 = inlined_call_operand.vmem [shape: f32[8,8,1], index: 1, kind: input, shape index: {}]   ;;  %s1149_s0 = inlined_call_operand.vmem [shape: bf16[8,8,128], index: 0, kind: input, shape index: {}]   ;;  %s1150_s2 = inlined_call_operand.vmem [shape: f32[128,128], index: 2, kind: input, shape index: {}]   ;;  %s1151_s5 = inlined_call_operand.vmem [shape: f32[8,128], index: 5, kind: input, shape index: {}]   ;;  %s1152_s3 = inlined_call_operand.vmem [shape: f32[128,128], index: 3, kind: input, shape index: {}]   ;;  %s1153_s4 = inlined_call_operand.vmem [shape: f32[128,128], index: 4, kind: input, shape index: {}]   ;;  %s1154_s6 = inlined_call_operand.vmem [shape: f32[1,128], index: 6, kind: input, shape index: {}]   ;;  %s1155_s7 = inlined_call_operand.vmem [shape: f32[8,128], index: 7, kind: output, shape index: {}]  }
   0x1   :  { %822 = vset.pattern.permute.xlu0 %v835_v0  ;;  %32 = vst.msk [vmem:[#allocation3] sm:$0xff] %vm31_vm0, %v836_v1  ;;  %v124_v2 = vld [vmem:[%s1148_s1] sm:$0xff]  ;;  %v125_v3 = vld [vmem:[%s1148_s1 + $0x8] sm:$0xff]  ;;  %v126_v4 = vld [vmem:[%s1148_s1 + $0x10] sm:$0xff]  ;;  %vm108_vm2 = vcmask 1042434   ;;  %vm110_vm3 = vcmask 1043459  }
   0x2   :  { %v127_v5 = vld [vmem:[%s1148_s1 + $0x18] sm:$0xff]  ;;  %v128_v6 = vld [vmem:[%s1148_s1 + $0x20] sm:$0xff]  ;;  %v133_v7 = vsel %vm31_vm0, %v124_v2, 0.0  ;;  %v129_v8 = vld [vmem:[%s1148_s1 + $0x28] sm:$0xff]  ;;  %v140_v11 = vsel %vm31_vm0, %v125_v3, 0.0  ;;  %v147_v12 = vsel %vm31_vm0, %v126_v4, 0.0 }
   0x3   :  { %v130_v9 = vld [vmem:[%s1148_s1 + $0x30] sm:$0xff]  ;;  %v134_v10 = vrot.slane %v133_v7, 4  ;;  %v141_v13 = vrot.slane %v140_v11, 4  ;;  %v148_v14 = vrot.slane %v147_v12, 4  ;;  %v154_v15 = vsel %vm31_vm0, %v127_v5, 0.0  ;;  %v131_v17 = vld [vmem:[%s1148_s1 + $0x38] sm:$0xff] }
   0x4   :  { %v161_v16 = vsel %vm31_vm0, %v128_v6, 0.0  ;;  %v155_v19 = vrot.slane %v154_v15, 4  ;;  %v168_v21 = vsel %vm31_vm0, %v129_v8, 0.0  ;;  %v175_v25 = vsel %vm31_vm0, %v130_v9, 0.0 }
   0x5   :  { %v135_v18 = vadd.f32 %v134_v10, %v133_v7  ;;  %v162_v20 = vrot.slane %v161_v16, 4  ;;  %v142_v22 = vadd.f32 %v141_v13, %v140_v11  ;;  %v149_v23 = vadd.f32 %v148_v14, %v147_v12  ;;  %v572_v11 = vld [vmem:[%s1149_s0] sm:$0xff]  }
   0x6   :  { %v169_v24 = vrot.slane %v168_v21, 4  ;;  %v156_v27 = vadd.f32 %v155_v19, %v154_v15  ;;  %v176_v29 = vrot.slane %v175_v25, 4  ;;  %v182_v33 = vsel %vm31_vm0, %v131_v17, 0.0  ;;  %v587_v15 = vld [vmem:[%s1149_s0 + $0x8] sm:$0xff]  }
   0x7   :  { %v136_v26 = vrot.slane %v135_v18, 2  ;;  %v163_v28 = vadd.f32 %v162_v20, %v161_v16  ;;  %v143_v30 = vrot.slane %v142_v22, 2  ;;  %v150_v31 = vrot.slane %v149_v23, 2 }
   0x8   :  { %v170_v32 = vadd.f32 %v169_v24, %v168_v21  ;;  %v157_v35 = vrot.slane %v156_v27, 2  ;;  %v177_v37 = vadd.f32 %v176_v29, %v175_v25  ;;  %v183_v41 = vrot.slane %v182_v33, 4  ;;  %v123_v6 = vld [vmem:[#allocation3] sm:$0xff]  ;;  %v589_v24 = vld [vmem:[%s1149_s0 + $0x18] sm:$0xff]  }
   0x9   :  { %v137_v34 = vadd.f32 %v136_v26, %v135_v18  ;;  %v164_v36 = vrot.slane %v163_v28, 2  ;;  %v144_v38 = vadd.f32 %v143_v30, %v142_v22  ;;  %v151_v39 = vadd.f32 %v150_v31, %v149_v23  ;;  %v588_v18 = vld [vmem:[%s1149_s0 + $0x10] sm:$0xff]  }
   0xa   :  { %v171_v40 = vrot.slane %v170_v32, 2  ;;  %v158_v43 = vadd.f32 %v157_v35, %v156_v27  ;;  %v178_v45 = vrot.slane %v177_v37, 2  ;;  %v184_v49 = vadd.f32 %v183_v41, %v182_v33 }
   0xb   :  { %v138_v42 = vrot.slane %v137_v34, 1  ;;  %v165_v44 = vadd.f32 %v164_v36, %v163_v28  ;;  %v145_v46 = vrot.slane %v144_v38, 1  ;;  %v152_v47 = vrot.slane %v151_v39, 1 }
   0xc   :  { %v172_v48 = vadd.f32 %v171_v40, %v170_v32  ;;  %v159_v51 = vrot.slane %v158_v43, 1  ;;  %v179_v53 = vadd.f32 %v178_v45, %v177_v37  ;;  %v185_v57 = vrot.slane %v184_v49, 2 }
   0xd   :  { %v139_v50 = vadd.f32 %v138_v42, %v137_v34  ;;  %v166_v52 = vrot.slane %v165_v44, 1  ;;  %v146_v54 = vadd.f32 %v145_v46, %v144_v38  ;;  %v153_v55 = vadd.f32 %v152_v47, %v151_v39 }
   0xe   :  { %v173_v56 = vrot.slane %v172_v48, 1  ;;  %v160_v58 = vadd.f32 %v159_v51, %v158_v43  ;;  %v180_v60 = vrot.slane %v179_v53, 1  ;;  %vm112_vm4 = vcmask 1044484  }
   0xf   :  { %v167_v59 = vadd.f32 %v166_v52, %v165_v44  ;;  %v186_v62 = vadd.f32 %v185_v57, %v184_v49  ;;  %v197_v63 = vsel %vm106_vm1, %v146_v54, %v139_v50  ;;  %vm114_vm5 = vcmask 1045509  }
  0x10   :  { %v174_v61 = vadd.f32 %v173_v56, %v172_v48  ;;  %v181_v0 = vadd.f32 %v180_v60, %v179_v53  ;;  %v198_v2 = vsel %vm108_vm2, %v153_v55, %v197_v63  ;;  %vm116_vm6 = vcmask 1046534  }
  0x11   :  { %v187_v3 = vrot.slane %v186_v62, 1  ;;  %v199_v4 = vsel %vm110_vm3, %v160_v58, %v198_v2  ;;  %vm118_vm7 = vcmask 1047559   ;;  %v573_v13 = vunpack.c.l.bf16 %v572_v11 }
  0x12   :  { %v200_v5 = vsel %vm112_vm4, %v167_v59, %v199_v4  ;;  %v574_v14 = vunpack.c.h.bf16 %v572_v11  ;;  %v577_v16 = vunpack.c.l.bf16 %v587_v15  ;;  %v578_v17 = vunpack.c.h.bf16 %v587_v15 }
  0x13   :  { %v188_v7 = vadd.f32 %v187_v3, %v186_v62  ;;  %v201_v8 = vsel %vm114_vm5, %v174_v61, %v200_v5  ;;  %v50_v19 = vrot.slane %v573_v13, 4  ;;  %v581_v21 = vunpack.c.l.bf16 %v588_v18 }
  0x14   :  { %v202_v9 = vsel %vm116_vm6, %v181_v0, %v201_v8  ;;  %v56_v20 = vrot.slane %v574_v14, 4  ;;  %v62_v22 = vrot.slane %v577_v16, 4  ;;  %v582_v23 = vunpack.c.h.bf16 %v588_v18 }
  0x15   :  { %v203_v10 = vsel %vm118_vm7, %v188_v7, %v202_v9  ;;  %v51_v25 = vadd.f32 %v573_v13, %v50_v19  ;;  %v68_v27 = vrot.slane %v578_v17, 4  ;;  %v585_v28 = vunpack.c.l.bf16 %v589_v24 }
  0x16   :  { %v205_v12 = vadd.f32 %v203_v10, %v123_v6  ;;  %v57_v26 = vadd.f32 %v574_v14, %v56_v20  ;;  %v63_v29 = vadd.f32 %v577_v16, %v62_v22  ;;  %v74_v30 = vrot.slane %v581_v21, 4  ;;  %v248_v22 = vld [vmem:[%s1150_s2 + $0x8] sm:$0xff] }
  0x17   :  { %v586_v31 = vunpack.c.h.bf16 %v589_v24  ;;  %v52_v32 = vrot.slane %v51_v25, 2  ;;  %v69_v34 = vadd.f32 %v578_v17, %v68_v27  ;;  %v80_v37 = vrot.slane %v582_v23, 4  ;;  %v251_v27 = vld [vmem:[%s1150_s2 + $0x20] sm:$0xff] }
  0x18   :  { %206 = vst.msk [vmem:[#allocation3] sm:$0xff] %vm31_vm0, %v205_v12  ;;  %v58_v33 = vrot.slane %v57_v26, 2  ;;  %v64_v35 = vrot.slane %v63_v29, 2  ;;  %v75_v36 = vadd.f32 %v581_v21, %v74_v30  ;;  %v86_v38 = vrot.slane %v585_v28, 4  ;;  %v247_v21 = vld [vmem:[%s1150_s2] sm:$0xff] }
  0x19   :  { %v53_v39 = vadd.f32 %v52_v32, %v51_v25  ;;  %v70_v41 = vrot.slane %v69_v34, 2  ;;  %v92_v42 = vrot.slane %v586_v31, 4  ;;  %v81_v46 = vadd.f32 %v582_v23, %v80_v37  ;;  %v249_v23 = vld [vmem:[%s1150_s2 + $0x10] sm:$0xff]  ;;  %v250_v25 = vld [vmem:[%s1150_s2 + $0x18] sm:$0xff]  ;;  %v255_v37 = vld [vmem:[%s1150_s2 + $0x40] sm:$0xff] }
  0x1a   :  { %v59_v40 = vadd.f32 %v58_v33, %v57_v26  ;;  %v65_v44 = vadd.f32 %v64_v35, %v63_v29  ;;  %v76_v45 = vrot.slane %v75_v36, 2  ;;  %v87_v47 = vadd.f32 %v585_v28, %v86_v38  ;;  %v252_v28 = vld [vmem:[%s1150_s2 + $0x28] sm:$0xff]  ;;  %v254_v35 = vld [vmem:[%s1150_s2 + $0x38] sm:$0xff] }
  0x1b   :  { %v54_v48 = vrot.slane %v53_v39, 1  ;;  %v71_v50 = vadd.f32 %v70_v41, %v69_v34  ;;  %v82_v53 = vrot.slane %v81_v46, 2  ;;  %v93_v58 = vadd.f32 %v586_v31, %v92_v42  ;;  %v253_v34 = vld [vmem:[%s1150_s2 + $0x30] sm:$0xff]  ;;  %v256_v38 = vld [vmem:[%s1150_s2 + $0x48] sm:$0xff]  ;;  %v258_v41 = vld [vmem:[%s1150_s2 + $0x58] sm:$0xff] }
  0x1c   :  { %v60_v49 = vrot.slane %v59_v40, 1  ;;  %v66_v51 = vrot.slane %v65_v44, 1  ;;  %v77_v52 = vadd.f32 %v76_v45, %v75_v36  ;;  %v88_v54 = vrot.slane %v87_v47, 2 }
  0x1d   :  { %v55_v55 = vadd.f32 %v54_v48, %v53_v39  ;;  %v72_v57 = vrot.slane %v71_v50, 1  ;;  %v83_v61 = vadd.f32 %v82_v53, %v81_v46  ;;  %v94_v0 = vrot.slane %v93_v58, 2  ;;  %v261_v46 = vld [vmem:[%s1150_s2 + $0x70] sm:$0xff]  ;;  %v564_v53 = vld [vmem:[%s1151_s5] ss:$0 sm:$0xff] }
  0x1e   :  { %v61_v56 = vadd.f32 %v60_v49, %v59_v40  ;;  %v67_v59 = vadd.f32 %v66_v51, %v65_v44  ;;  %v78_v60 = vrot.slane %v77_v52, 1  ;;  %v89_v62 = vadd.f32 %v88_v54, %v87_v47  ;;  %v257_v40 = vld [vmem:[%s1150_s2 + $0x50] sm:$0xff]  ;;  %v260_v44 = vld [vmem:[%s1150_s2 + $0x68] sm:$0xff]  ;;  %v262_v47 = vld [vmem:[%s1150_s2 + $0x78] sm:$0xff] }
  0x1f   :  { %v217_v43 = vld [vmem:[#allocation3] sm:$0xff]  ;;  %v73_v63 = vadd.f32 %v72_v57, %v71_v50  ;;  %v84_v4 = vrot.slane %v83_v61, 1  ;;  %v95_v7 = vadd.f32 %v94_v0, %v93_v58  ;;  %v837_v20 = vmov 0.0|0.0  }
  0x20   :  { %823 = vrsqrt.f32 %v217_v43  ;;  %v107_v2 = vsel %vm106_vm1, %v61_v56, %v55_v55  ;;  %v79_v3 = vadd.f32 %v78_v60, %v77_v52  ;;  %v90_v5 = vrot.slane %v89_v62, 1  ;;  %746 = vmatprep.subr.bf16.mxu0 %v837_v20  ;;  %770 = vmatprep.subr.bf16.mxu1 %v837_v20  ;;  %v259_v43 = vld [vmem:[%s1150_s2 + $0x60] sm:$0xff] }
  0x21   :  { %v109_v6 = vsel %vm108_vm2, %v67_v59, %v107_v2  ;;  %v85_v9 = vadd.f32 %v84_v4, %v83_v61  ;;  %v96_v12 = vrot.slane %v95_v7, 1  ;;  %v747_v24 = vpack.c.bf16 %v248_v22, %v247_v21  ;;  %v565_v55 = vld [vmem:[%s1151_s5 + $0x1] ss:$0 sm:$0xff]  ;;  %v566_v58 = vld [vmem:[%s1151_s5 + $0x2] ss:$0 sm:$0xff]  ;;  %v373_v22 = vld [vmem:[%s1152_s3 + $0x48] sm:$0xff] }
  0x22   :  { %v111_v8 = vsel %vm110_vm3, %v73_v63, %v109_v6  ;;  %v91_v10 = vadd.f32 %v90_v5, %v89_v62  ;;  %v750_v26 = vpack.c.bf16 %v250_v25, %v249_v23  ;;  %v753_v29 = vpack.c.bf16 %v252_v28, %v251_v27  ;;  %v365_v5 = vld [vmem:[%s1152_s3 + $0x8] sm:$0xff]  ;;  %v366_v6 = vld [vmem:[%s1152_s3 + $0x10] sm:$0xff]  ;;  %v372_v21 = vld [vmem:[%s1152_s3 + $0x40] sm:$0xff] }
  0x23   :  { %v113_v11 = vsel %vm112_vm4, %v79_v3, %v111_v8  ;;  %v97_v15 = vadd.f32 %v96_v12, %v95_v7  ;;  %748 = vmatpush3.bf16.msra.mxu0 %v747_v24  ;;  %v756_v36 = vpack.c.bf16 %v254_v35, %v253_v34  ;;  %v759_v39 = vpack.c.bf16 %v256_v38, %v255_v37  ;;  %v367_v8 = vld [vmem:[%s1152_s3 + $0x18] sm:$0xff]  ;;  %v374_v24 = vld [vmem:[%s1152_s3 + $0x50] sm:$0xff]  ;;  %v376_v27 = vld [vmem:[%s1152_s3 + $0x60] sm:$0xff] }
  0x24   :  { %v115_v13 = vsel %vm114_vm5, %v85_v9, %v113_v11  ;;  %749 = vmatprep.subr.bf16.mxu0 %v837_v20  ;;  %vm838_vm8 = vmmov 0   ;;  %v762_v42 = vpack.c.bf16 %v258_v41, %v257_v40  ;;  %v765_v45 = vpack.c.bf16 %v260_v44, %v259_v43  ;;  %v369_v11 = vld [vmem:[%s1152_s3 + $0x28] sm:$0xff]  ;;  %v375_v25 = vld [vmem:[%s1152_s3 + $0x58] sm:$0xff]  ;;  %v462_v35 = vld [vmem:[%s1153_s4 + $0x10] sm:$0xff] }
  0x25   :  { %v117_v16 = vsel %vm116_vm6, %v91_v10, %v115_v13  ;;  %673 = vmatprep.mubr.msk.f32.mxu0 %vm838_vm8, %v836_v1  ;;  %708 = vmatprep.mubr.msk.f32.mxu1 %vm838_vm8, %v836_v1  ;;  %v768_v48 = vpack.c.bf16 %v262_v47, %v261_v46  ;;  %v774_v9 = vpack.c.bf16 %v367_v8, %v366_v6  ;;  %v368_v10 = vld [vmem:[%s1152_s3 + $0x20] sm:$0xff]  ;;  %v377_v28 = vld [vmem:[%s1152_s3 + $0x68] sm:$0xff]  ;;  %v463_v37 = vld [vmem:[%s1153_s4 + $0x18] sm:$0xff] }
  0x26   :  { %v119_v17 = vsel %vm118_vm7, %v97_v15, %v117_v16  ;;  %v777_v12 = vpack.c.bf16 %v369_v11, %v368_v10  ;;  %v783_v23 = vpack.c.bf16 %v373_v22, %v372_v21  ;;  %v461_v34 = vld [vmem:[%s1153_s4 + $0x8] sm:$0xff]  ;;  %v798_v38 = vpack.c.bf16 %v463_v37, %v462_v35  ;;  %v567_v46 = vld [vmem:[%s1151_s5 + $0x3] ss:$0 sm:$0xff] }
  0x27   :  { %751 = vmatpush3.bf16.msra.mxu0 %v750_v26  ;;  %v786_v26 = vpack.c.bf16 %v375_v25, %v374_v24  ;;  %v465_v40 = vld [vmem:[%s1153_s4 + $0x28] sm:$0xff] }
  0x28   :  { %752 = vmatprep.subr.bf16.mxu0 %v837_v20 }
  0x2a   :  { %v824_v14 = vpop.eup %823 }
  0x2b   :  { %221 = vperm.xlu0 %822, %v824_v14   ;;  %754 = vmatpush3.bf16.msra.mxu0 %v753_v29  ;;  %v789_v29 = vpack.c.bf16 %v377_v28, %v376_v27 }
  0x2c   :  { %755 = vmatprep.subr.bf16.mxu0 %v837_v20 }
  0x2f   :  { %757 = vmatpush3.bf16.msra.mxu0 %v756_v36 }
  0x30   :  { %758 = vmatprep.subr.bf16.mxu0 %v837_v20 }
  0x33   :  { %760 = vmatpush3.bf16.msra.mxu0 %v759_v39  ;;  %v464_v39 = vld [vmem:[%s1153_s4 + $0x20] sm:$0xff] }
  0x34   :  { %761 = vmatprep.subr.bf16.mxu0 %v837_v20  ;;  %v801_v41 = vpack.c.bf16 %v465_v40, %v464_v39 }
  0x37   :  { %763 = vmatpush3.bf16.msra.mxu0 %v762_v42 }
  0x38   :  { %764 = vmatprep.subr.bf16.mxu0 %v837_v20 }
  0x3b   :  { %766 = vmatpush3.bf16.msra.mxu0 %v765_v45 }
  0x3c   :  { %767 = vmatprep.subr.bf16.mxu0 %v837_v20 }
  0x3f   :  { %769 = vmatpush3.bf16.msra.mxu0 %v768_v48  ;;  %v568_v48 = vld [vmem:[%s1151_s5 + $0x4] ss:$0 sm:$0xff] }
  0x40   :  { %794 = vmatprep.subr.bf16.mxu0 %v837_v20 }
  0xaa   :  { %v222_v18 = vpop.permute.xlu0 %221 }
  0xab   :  { %v940_v19 = vmul.f32 %v222_v18, %v119_v17  ;;  %v370_v17 = vld [vmem:[%s1152_s3 + $0x30] sm:$0xff]  ;;  %v371_v18 = vld [vmem:[%s1152_s3 + $0x38] sm:$0xff] }
  0xad   :  { %225 = vadd.xlane.f32.xlu0 %v940_v19 }
 0x13a   :  { %v226_v30 = vpop.xlane.xlu0 %225 }
 0x13b   :  { %v228_v31 = vmul.f32 0.0078125, %v226_v30  ;;  %v378_v30 = vld [vmem:[%s1152_s3 + $0x70] sm:$0xff] }
 0x13d   :  { %v229_v32 = vsub.f32 %v940_v19, %v228_v31  ;;  %v379_v31 = vld [vmem:[%s1152_s3 + $0x78] sm:$0xff] }
 0x13f   :  { %v230_v33 = vmul.f32 %v229_v32, %v229_v32 }
 0x141   :  { %231 = vadd.xlane.f32.xlu1 %v230_v33  ;;  %v460_v33 = vld [vmem:[%s1153_s4] sm:$0xff] }
 0x142   :  { %v795_v36 = vpack.c.bf16 %v461_v34, %v460_v33 }
 0x1ce   :  { %v232_v49 = vpop.xlane.xlu1 %231 }
 0x1cf   :  { %v233_v50 = vmul.f32 0.0078125, %v232_v49 }
 0x1d1   :  { %v234_v51 = vadd.f32 1e-05, %v233_v50 }
 0x1d3   :  { %825 = vrsqrt.f32 %v234_v51  ;;  %v466_v51 = vld [vmem:[%s1153_s4 + $0x30] sm:$0xff] }
 0x1dd   :  { %v826_v52 = vpop.eup %825 }
 0x1de   :  { %v236_v54 = vmul.f32 %v826_v52, %v229_v32  ;;  %v792_v32 = vpack.c.bf16 %v379_v31, %v378_v30  ;;  %v467_v52 = vld [vmem:[%s1153_s4 + $0x38] sm:$0xff] }
 0x1e0   :  { %v241_v56 = vmul.f32 %v564_v53, %v236_v54  ;;  %v804_v53 = vpack.c.bf16 %v467_v52, %v466_v51  ;;  %v468_v54 = vld [vmem:[%s1153_s4 + $0x40] sm:$0xff] }
 0x1e2   :  { %v246_v57 = vadd.f32 %v565_v55, %v241_v56  ;;  %v469_v55 = vld [vmem:[%s1153_s4 + $0x48] sm:$0xff] }
 0x1e3   :  { %v807_v56 = vpack.c.bf16 %v469_v55, %v468_v54 }
 0x1e4   :  { %674 = vmatmul.mubr.f32.vlgmr.msra.gmra.mrb[0].mxu0 %v246_v57  ;;  %v470_v57 = vld [vmem:[%s1153_s4 + $0x50] sm:$0xff] }
 0x1e5   :  { %743 = vmatprep.mubr.msk.f32.mxu0 %vm838_vm8, %v836_v1  ;;  %v364_v1 = vld [vmem:[%s1152_s3] sm:$0xff]  ;;  %796 = vmatpush3.bf16.msra.mxu0 %v795_v36 }
 0x1e6   :  { %v771_v7 = vpack.c.bf16 %v365_v5, %v364_v1  ;;  %797 = vmatprep.subr.bf16.mxu0 %v837_v20 }
 0x1e8   :  { %772 = vmatpush3.bf16.msra.mxu1 %v771_v7 }
 0x1e9   :  { %773 = vmatprep.subr.bf16.mxu1 %v837_v20  ;;  %799 = vmatpush3.bf16.msra.mxu0 %v798_v38 }
 0x1ea   :  { %800 = vmatprep.subr.bf16.mxu0 %v837_v20 }
 0x1ec   :  { %775 = vmatpush3.bf16.msra.mxu1 %v774_v9 }
 0x1ed   :  { %776 = vmatprep.subr.bf16.mxu1 %v837_v20  ;;  %802 = vmatpush3.bf16.msra.mxu0 %v801_v41 }
 0x1ee   :  { %803 = vmatprep.subr.bf16.mxu0 %v837_v20 }
 0x1f0   :  { %778 = vmatpush3.bf16.msra.mxu1 %v777_v12  ;;  %v570_v12 = vld [vmem:[%s1154_s6] ss:$0 sm:$0xff] }
 0x1f1   :  { %779 = vmatprep.subr.bf16.mxu1 %v837_v20  ;;  %805 = vmatpush3.bf16.msra.mxu0 %v804_v53 }
 0x1f2   :  { %806 = vmatprep.subr.bf16.mxu0 %v837_v20 }
 0x1f5   :  { %808 = vmatpush3.bf16.msra.mxu0 %v807_v56 }
 0x1f6   :  { %809 = vmatprep.subr.bf16.mxu0 %v837_v20 }
 0x2b7   :  { %v333_v59 = vpop.f32.mrb[0].mxu0 }
 0x2b8   :  { %v334_v60 = vadd.f32 %v566_v58, %v333_v59  ;;  %v675_v61 = vpop.f32.mrb[1].mxu0  ;;  %v471_v58 = vld [vmem:[%s1153_s4 + $0x58] sm:$0xff] }
 0x2b9   :  { %v810_v59 = vpack.c.bf16 %v471_v58, %v470_v57  ;;  %v473_v61 = vld [vmem:[%s1153_s4 + $0x68] sm:$0xff] }
 0x2ba   :  { %v338_v62 = vmul.f32 0.70710677, %v334_v60  ;;  %v337_v0 = vmul.f32 0.5, %v334_v60  ;;  %v472_v60 = vld [vmem:[%s1153_s4 + $0x60] sm:$0xff] }
 0x2bb   :  { %811 = vmatpush3.bf16.msra.mxu0 %v810_v59 }
 0x2bc   :  { %827 = verf.f32 %v338_v62  ;;  %812 = vmatprep.subr.bf16.mxu0 %v837_v20  ;;  %v813_v62 = vpack.c.bf16 %v473_v61, %v472_v60 }
 0x2bf   :  { %814 = vmatpush3.bf16.msra.mxu0 %v813_v62 }
 0x2c0   :  { %815 = vmatprep.subr.bf16.mxu0 %v837_v20 }
 0x2c6   :  { %v828_v63 = vpop.eup %827 }
 0x2c7   :  { %v340_v2 = vadd.f32 1.0, %v828_v63  ;;  %v474_v63 = vld [vmem:[%s1153_s4 + $0x70] sm:$0xff] }
 0x2c9   :  { %v341_v3 = vmul.f32 %v340_v2, %v337_v0  ;;  %v475_v0 = vld [vmem:[%s1153_s4 + $0x78] sm:$0xff] }
 0x2ca   :  { %v816_v2 = vpack.c.bf16 %v475_v0, %v474_v63 }
 0x2cb   :  { %v1018_v4 = vadd.f32 %v341_v3, %v940_v19  ;;  %v780_v19 = vpack.c.bf16 %v371_v18, %v370_v17  ;;  %v569_v3 = vld [vmem:[%s1151_s5 + $0x5] ss:$0 sm:$0xff] }
 0x2cc   :  { %817 = vmatpush3.bf16.msra.mxu0 %v816_v2 }
 0x2cd   :  { %343 = vadd.xlane.f32.xlu1 %v1018_v4  ;;  %781 = vmatpush3.bf16.msra.mxu1 %v780_v19 }
 0x2ce   :  { %782 = vmatprep.subr.bf16.mxu1 %v837_v20 }
 0x2d1   :  { %784 = vmatpush3.bf16.msra.mxu1 %v783_v23 }
 0x2d2   :  { %785 = vmatprep.subr.bf16.mxu1 %v837_v20 }
 0x2d5   :  { %787 = vmatpush3.bf16.msra.mxu1 %v786_v26 }
 0x2d6   :  { %788 = vmatprep.subr.bf16.mxu1 %v837_v20 }
 0x2d9   :  { %790 = vmatpush3.bf16.msra.mxu1 %v789_v29 }
 0x2da   :  { %791 = vmatprep.subr.bf16.mxu1 %v837_v20 }
 0x2dd   :  { %793 = vmatpush3.bf16.msra.mxu1 %v792_v32 }
 0x35a   :  { %v344_v13 = vpop.xlane.xlu1 %343 }
 0x35b   :  { %v345_v14 = vmul.f32 0.0078125, %v344_v13 }
 0x35d   :  { %v346_v15 = vsub.f32 %v1018_v4, %v345_v14 }
 0x35f   :  { %v347_v16 = vmul.f32 %v346_v15, %v346_v15 }
 0x361   :  { %348 = vadd.xlane.f32.xlu1 %v347_v16 }
 0x3ee   :  { %v349_v42 = vpop.xlane.xlu1 %348 }
 0x3ef   :  { %v350_v43 = vmul.f32 0.0078125, %v349_v42 }
 0x3f1   :  { %v351_v44 = vadd.f32 1e-05, %v350_v43 }
 0x3f3   :  { %829 = vrsqrt.f32 %v351_v44 }
 0x3fd   :  { %v830_v45 = vpop.eup %829 }
 0x3fe   :  { %v353_v47 = vmul.f32 %v830_v45, %v346_v15 }
 0x400   :  { %v358_v49 = vmul.f32 %v567_v46, %v353_v47 }
 0x402   :  { %v363_v50 = vadd.f32 %v568_v48, %v358_v49 }
 0x404   :  { %709 = vmatmul.mubr.f32.vlgmr.msra.gmra.mrb[0].mxu1 %v363_v50 }
 0x4d7   :  { %v450_v1 = vpop.f32.mrb[0].mxu1 }
 0x4d8   :  { %v451_v5 = vadd.f32 %v569_v3, %v450_v1  ;;  %v710_v6 = vpop.f32.mrb[1].mxu1 }
 0x4da   :  { %v455_v7 = vmul.f32 0.70710677, %v451_v5  ;;  %v454_v8 = vmul.f32 0.5, %v451_v5 }
 0x4dc   :  { %831 = verf.f32 %v455_v7 }
 0x4e6   :  { %v832_v20 = vpop.eup %831 }
 0x4e7   :  { %v457_v9 = vadd.f32 1.0, %v832_v20 }
 0x4e9   :  { %v458_v10 = vmul.f32 %v457_v9, %v454_v8 }
 0x4eb   :  { %v459_v11 = vadd.f32 %v458_v10, %v1018_v4 }
 0x4ed   :  { %744 = vmatmul.mubr.f32.vlgmr.msra.gmra.mrb[2].mxu0 %v459_v11 }
 0x5c0   :  { %v549_v13 = vpop.f32.mrb[2].mxu0 }
 0x5c1   :  { %v550_v14 = vadd.f32 %v570_v12, %v549_v13  ;;  %v745_v15 = vpop.f32.mrb[3].mxu0 }
 0x5c3   :  { %v553_v16 = vmul.f32 %v550_v14, %v550_v14 }
 0x5c5   :  { %554 = vadd.xlane.f32.xlu1 %v553_v16 }
 0x652   :  { %v555_v17 = vpop.xlane.xlu1 %554 }
 0x653   :  { %v556_v18 = vmax.f32 %v555_v17, 1e-24 }
 0x655   :  { %833 = vrsqrt.f32 %v556_v18 }
 0x65f   :  { %v834_v19 = vpop.eup %833 }
 0x660   :  { %v558_v21 = vmul.f32 %v834_v19, %v550_v14 }
 0x662   :  { %559 = vst [vmem:[%s1155_s7] sm:$0xff] %v558_v21 }

</bundles_post_ra>
